<compile_context>
chip_gen: v6e
topology: v6e:2x2x1
jax: 0.10.0
libtpu: 0.0.40
codegen_flags: <defaults>
</compile_context>

<pallas_src>
import jax
import jax.numpy as jnp
from jax.experimental import pallas as pl
from jax.experimental.pallas import tpu as pltpu


def _copy_kernel(x_ref, o_ref):
    # The unshuffle itself is the (free) row-major reinterpretation done by the
    # wrapper; the kernel only streams full-width, lane-dense tiles.
    o_ref[...] = x_ref[...]


def _sublane_tile(dtype) -> int:
    # f32 -> 8, bf16/f16 -> 16, int8/fp8 -> 32 (sub-32-bit dtypes pack sublanes).
    return max(8, 32 // jnp.dtype(dtype).itemsize)


def _pick_lane_width(total: int, itemsize: int, lane_cap_bytes: int = 64 * 1024) -> int:
    """Largest multiple of 128 that divides `total` and keeps one row under
    `lane_cap_bytes`.  Returns 0 if no multiple of 128 divides `total`."""
    if total % 128 != 0:
        return 0
    cap_lanes = max(128, lane_cap_bytes // itemsize)
    q = total // 128
    best = 128
    d = 1
    while d * d <= q:
        if q % d == 0:
            for f in (d, q // d):
                cand = 128 * f
                if best < cand <= cap_lanes:
                    best = cand
        d += 1
    return best


def _pick_row_tile(rows: int, row_bytes: int, sublane: int, tile_budget_bytes: int):
    """Return (tile_rows, grid_steps). Tile rows are a multiple of the dtype's
    sublane tile (or the full extent) so blocks obey the (8,128) constraint."""
    max_rows_by_budget = max(1, tile_budget_bytes // max(1, row_bytes))
    if rows <= max_rows_by_budget:
        # Whole slab fits one tile. Split in two only when the slab is large
        # enough that per-step overhead is negligible, so v7x's second
        # TensorCore gets work without penalizing small tensors.
        if rows * row_bytes > (2 << 20) and rows % (2 * sublane) == 0:
            return rows // 2, 2
        return rows, 1
    # Largest multiple of `sublane` within budget that divides rows evenly.
    max_tr = (max_rows_by_budget // sublane) * sublane
    t = max_tr
    while t >= sublane:
        if rows % t == 0:
            return t, rows // t
        t -= sublane
    # No clean divisor: clamp to the budget and let Pallas mask the boundary
    # block (correct for a pure copy; keeps VMEM at the intended size).
    tr = max(sublane, max_tr)
    return tr, pl.cdiv(rows, tr)


def gaussian_unshuffle_1d(x, *, tile_budget_bytes: int = 6 * 1024 * 1024):
    """Pallas TPU implementation of GaussianUnshuffle1D.forward for (B, C, L).

    NOTE: if a freshly materialized buffer is not required by the caller,
    prefer plain `jnp.reshape(x, (B, C // 2, 2 * L))` — it is metadata-only.
    """
    B, C, L = x.shape
    assert C % 2 == 0, "channel dim must be even"
    out_shape3d = (B, C // 2, 2 * L)
    total = B * C * L
    itemsize = jnp.dtype(x.dtype).itemsize
    sublane = _sublane_tile(x.dtype)

    # Free row-major flatten to a lane-dense 2D slab (exact reshape semantics:
    # contiguous memory is untouched, only metadata changes).
    lanes = _pick_lane_width(total, itemsize)
    if lanes == 0:
        # Element count not a multiple of 128: fall back to the natural slab
        # (full-extent last dim, possibly masked stores — still correct).
        lanes = 2 * L
    rows = total // lanes
    y2d = jnp.reshape(x, (rows, lanes))

    tr, steps = _pick_row_tile(rows, lanes * itemsize, sublane, tile_budget_bytes)

    step_bytes = 4 * tr * lanes * itemsize            # in + out, double-buffered
    # 48 MiB cap: comfortably under v7x's 64 MiB per-TC VMEM, trivially under
    # v5e/v6e's 128 MiB.
    vmem_limit_bytes = int(min(48 << 20, max(32 << 20, step_bytes + (2 << 20))))

    out2d = pl.pallas_call(
        _copy_kernel,
        out_shape=jax.ShapeDtypeStruct((rows, lanes), x.dtype),
        grid_spec=pltpu.PrefetchScalarGridSpec(
            num_scalar_prefetch=0,
            grid=(steps,),
            # Last dim is the full slab width (a large multiple of 128 whenever
            # possible) -> unmasked, lane-dense vst; single flat "parallel"
            # axis spans batches and balances across TensorCores.
            in_specs=[pl.BlockSpec((tr, lanes), lambda i: (i, 0))],
            out_specs=pl.BlockSpec((tr, lanes), lambda i: (i, 0)),
        ),
        compiler_params=pltpu.CompilerParams(
            dimension_semantics=("parallel",),
            vmem_limit_bytes=vmem_limit_bytes,
        ),
        cost_estimate=pl.CostEstimate(
            flops=0,
            transcendentals=0,
            bytes_accessed=2 * total * itemsize,
        ),
    )(y2d)

    # Free metadata change back to the module's output shape.
    return jnp.reshape(out2d, out_shape3d)


if __name__ == "__main__":
    key = jax.random.PRNGKey(0)
    B, C, L = 2, 4, 16
    x = jax.random.normal(key, (B, C, L), dtype=jnp.float32)

    out = jax.block_until_ready(gaussian_unshuffle_1d(x))

    # Reference: exact torch.reshape semantics (row-major reinterpretation).
    ref = jnp.reshape(x, (B, C // 2, 2 * L))

    assert out.shape == (B, C // 2, 2 * L), out.shape
    assert out.dtype == x.dtype
    assert jnp.array_equal(out, ref), "mismatch vs reference reshape"
    print("KERNEL_OK")
</pallas_src>

<mosaic_0001>
module attributes {stable_mosaic.version = 11 : i64} {
  func.func @_copy_kernel(%arg0: i32, %arg1: memref<1x128xf32, #tpu.memory_space<vmem>>, %arg2: memref<1x128xf32, #tpu.memory_space<vmem>>) attributes {dimension_semantics = [#tpu.dimension_semantics<parallel>], iteration_bounds = array<i64: 1>, scalar_prefetch = 0 : i64, scratch_operands = 0 : i64, tpu.core_type = #tpu.core_type<tc>, window_params = [{transform_indices = @transform_0, window_bounds = array<i64: 1, 128>}, {transform_indices = @transform_1, window_bounds = array<i64: 1, 128>}]} {
    %c0 = arith.constant 0 : index
    %c0_0 = arith.constant 0 : index
    %0 = vector.load %arg1[%c0, %c0_0] : memref<1x128xf32, #tpu.memory_space<vmem>>, vector<1x128xf32>
    %c0_1 = arith.constant 0 : index
    %c0_2 = arith.constant 0 : index
    %1 = vector.load %arg2[%c0_1, %c0_2] : memref<1x128xf32, #tpu.memory_space<vmem>>, vector<1x128xf32>
    tpu.vector_store %arg2[%c0_1, %c0_2], %0 {strides = array<i32>} : memref<1x128xf32, #tpu.memory_space<vmem>>, vector<1x128xf32>,
    return
  }
  func.func @transform_0(%arg0: i32) -> (i32, i32) {
    %c0_i32 = arith.constant 0 : i32
    %c0_i32_0 = arith.constant 0 : i32
    return %arg0, %c0_i32 : i32, i32
  }
  func.func @transform_1(%arg0: i32) -> (i32, i32) {
    %c0_i32 = arith.constant 0 : i32
    %c0_i32_0 = arith.constant 0 : i32
    return %arg0, %c0_i32 : i32, i32
  }
}

</mosaic_0001>

<bundles_post_ra>
// kernel: tpu_custom_call.1
= control target key start
LH: loop header
LB: loop body
LE: loop exit
PB: predicated region body
PF: predicated region fallthrough
CT: control target
= control target key end

     0   :  { %6 = vsyncpa [#allocation3], 0  ;;  %s102_s0 = inlined_call_operand.hbm [shape: f32[1,128], index: 0, kind: input, shape index: {}]   ;;  %s103_s1 = inlined_call_operand.hbm [shape: f32[1,128], index: 1, kind: output, shape index: {}]  }
   0x1   :  { %7 = vsyncpa [#allocation4], 0  ;;  %s84_s6 = smov [#allocation2]  }
   0x2   :  { %s14_s7 = sshll.u32 %s84_s6, 4  ;;  %s15_s7 = int_to_ptr.vmem [resolvable:$true] %s14_s7 }
   0x3   :  { %s48_s8 = scalar_lea.vmem %s15_s7, 16  ;;  %s52_s9 = scalar_lea.vmem %s15_s7, 32 }
   0x4   :  { %p49_p0 = scmp.ne.s32.totalorder %s15_s7, %s48_s8  ;;  %p53_p1 = scmp.lt.s32.totalorder %s15_s7, %s15_s7 }
   0x5   :  { %p54_p2 = scmp.lt.s32.totalorder %s52_s9, %s48_s8 }
   0x7   :  { %p55_p3 = por %p54_p2, %p53_p1 }
   0x9   :  { %p56_p4 = pnand %p55_p3, %p49_p0 }
   0xb   :  { %59 = shalt.err (!%p56_p4)
}
   0xc   :  { %17 = dma.hbm_to_vmem [thread:$0]  %s102_s0, 16, %s15_s7, [#allocation3]  }
   0xd   :  { %80 = dma.done.wait [#allocation3], 16  }
   0xe   :  { %81 = vsyncadd [#allocation3], 4294967280  ;;  %s85_s12 = smov [#allocation5]   ;;  %v21_v0 = vld [vmem:[#allocation2] sm:$0x1] }
   0xf   :  { %s29_s13 = sshll.u32 %s85_s12, 4  ;;  %22 = vst [vmem:[#allocation5] sm:$0x1] %v21_v0  ;;  %s30_s13 = int_to_ptr.vmem [resolvable:$true] %s29_s13 }
  0x10   :  { %s60_s14 = scalar_lea.vmem %s30_s13, 16  ;;  %s64_s15 = scalar_lea.vmem %s30_s13, 32 }
  0x11   :  { %p61_p5 = scmp.ne.s32.totalorder %s30_s13, %s60_s14  ;;  %p65_p6 = scmp.lt.s32.totalorder %s30_s13, %s30_s13 }
  0x12   :  { %p66_p7 = scmp.lt.s32.totalorder %s64_s15, %s60_s14 }
  0x14   :  { %p67_p8 = por %p66_p7, %p65_p6 }
  0x16   :  { %p68_p9 = pnand %p67_p8, %p61_p5 }
  0x18   :  { %71 = shalt.err (!%p68_p9)
}
  0x19   :  { %32 = dma.vmem_to_hbm [thread:$0]  %s30_s13, 16, %s103_s1, [#allocation4]  }
  0x1a   :  { %82 = dma.done.wait [#allocation4], 16  }
  0x1b   :  { %83 = vsyncadd [#allocation4], 4294967280 }
  0x1c   :  { %36 = vsyncpa [#allocation3], 1 }
  0x1d   :  { %37 = vsyncpa [#allocation4], 1 }

</bundles_post_ra>
